<compile_context>
chip_gen: v5e
topology: v5e:2x2
jax: 0.10.0
libtpu: 0.0.40
codegen_flags: <defaults>
</compile_context>

<pallas_src>
import numpy as np
import jax
import jax.numpy as jnp
from jax.experimental import pallas as pl
from jax.experimental.pallas import tpu as pltpu

_LANES = 128


def _mvn_kernel(params_ref, x_ref, y_ref, out_ref):
    # params_ref (SMEM, f32[8]):
    #   [mu0, mu1, a', bc', d', scale, pad, pad]
    # where  a' = -0.5*inv[0,0], bc' = -0.5*(inv[0,1]+inv[1,0]), d' = -0.5*inv[1,1]
    mu0 = params_ref[0]
    mu1 = params_ref[1]
    a = params_ref[2]
    bc = params_ref[3]
    d = params_ref[4]
    scale = params_ref[5]

    dx = x_ref[...] - mu0                      # (block_rows, 128) dense
    dy = y_ref[...] - mu1

    # rowwise quadratic form with -0.5 already folded into a', bc', d'
    q = (a * dx) * dx + (bc * dx) * dy + (d * dy) * dy

    out_ref[...] = jnp.exp(q) * scale


def _fold_params(mu, cov):
    """2x2 inverse / det / normalizer (one-time parameter glue, plain JAX)."""
    cov_f = jnp.asarray(cov, jnp.float32)
    mu_f = jnp.asarray(mu, jnp.float32).reshape(-1)
    det = cov_f[0, 0] * cov_f[1, 1] - cov_f[0, 1] * cov_f[1, 0]
    inv00 = cov_f[1, 1] / det
    inv01 = -cov_f[0, 1] / det
    inv10 = -cov_f[1, 0] / det
    inv11 = cov_f[0, 0] / det
    scale = 1.0 / jnp.sqrt(4.0 * np.pi ** 2 * det)
    a = -0.5 * inv00
    bc = -0.5 * (inv01 + inv10)
    d = -0.5 * inv11
    return mu_f, a, bc, d, scale


def multivariate_normal_pallas(X, mu, cov=None, diag_cov=None, *,
                               block_rows=512, min_pallas_points=1024):
    """Pallas implementation of MultiVariateNormal.forward.

    X: (n, 2) points. mu: (2,). Exactly one of cov (2,2) / diag_cov (2,).
    Returns: (n,) float32 densities.

    block_rows: rows of 128 points per grid step (multiple of 8);
                block covers block_rows*128 points.
    min_pallas_points: below this n, compute directly in fused XLA.
    """
    if diag_cov is not None:
        if cov is not None:
            raise RuntimeError("can only specify cov or diag_cov! not both")
        cov = jnp.diag(jnp.asarray(diag_cov, jnp.float32))
    if cov is None:
        raise RuntimeError("can only specify cov or diag_cov! not both")

    assert cov.shape[0] == X.shape[1] == 2
    assert block_rows % 8 == 0

    mu_f, a, bc, d, scale = _fold_params(mu, cov)

    n = X.shape[0]
    Xf = jnp.asarray(X, jnp.float32)

    if n < min_pallas_points:
        # Tiny-n fast path: pallas launch + padding would dominate.
        dx = Xf[:, 0] - mu_f[0]
        dy = Xf[:, 1] - mu_f[1]
        return jnp.exp(a * dx * dx + bc * dx * dy + d * dy * dy) * scale

    params = jnp.stack([mu_f[0], mu_f[1], a, bc, d, scale,
                        jnp.float32(0.0), jnp.float32(0.0)])

    block_points = block_rows * _LANES
    n_pad = pl.cdiv(n, block_points) * block_points
    pad = n_pad - n
    rows_total = n_pad // _LANES

    # SoA split + pad + reshape into lane-dense (rows, 128) slabs.
    # TODO(synk): if upstream can hand us x/y already in SoA slabs, this
    # single re-layout pass (the only extra HBM traffic) disappears entirely.
    x_col = jnp.pad(Xf[:, 0], (0, pad)).reshape(rows_total, _LANES)
    y_col = jnp.pad(Xf[:, 1], (0, pad)).reshape(rows_total, _LANES)

    out2d = pl.pallas_call(
        _mvn_kernel,
        out_shape=jax.ShapeDtypeStruct((rows_total, _LANES), jnp.float32),
        grid_spec=pltpu.PrefetchScalarGridSpec(
            num_scalar_prefetch=1,
            grid=(rows_total // block_rows,),
            in_specs=[
                pl.BlockSpec((block_rows, _LANES), lambda i, p: (i, 0)),
                pl.BlockSpec((block_rows, _LANES), lambda i, p: (i, 0)),
            ],
            out_specs=pl.BlockSpec((block_rows, _LANES), lambda i, p: (i, 0)),
        ),
        compiler_params=pltpu.CompilerParams(
            dimension_semantics=("parallel",)),
    )(params, x_col, y_col)

    # Padded tail lanes hold finite junk (density at (0,0)-mu); slice them off.
    return out2d.reshape(-1)[:n]


def _reference(X, mu, cov=None, diag_cov=None):
    # Pure-JAX reference mirroring the PyTorch forward (rowwise quadratic form
    # instead of materializing the full n x n matrix, mathematically identical
    # to diag(mdist1 @ diff.T)).
    if diag_cov is not None:
        cov = jnp.diag(diag_cov)
    cov_f = jnp.asarray(cov, jnp.float32)
    diff = (jnp.asarray(X) - jnp.asarray(mu)).astype(jnp.float32)
    mdist1 = diff @ jnp.linalg.inv(cov_f)
    mdist = jnp.sum(mdist1 * diff, axis=1)
    return jnp.exp(-0.5 * mdist) / jnp.sqrt(4 * np.pi ** 2 * jnp.linalg.det(cov_f))


if __name__ == "__main__":
    key = jax.random.PRNGKey(0)

    mu = jnp.array([0.5, 0.5], dtype=jnp.float32)
    cov = jnp.array([[0.20, 0.05],
                     [0.05, 0.30]], dtype=jnp.float32)

    # Pallas path: n not a multiple of the block size -> exercises padding and
    # a multi-block (grid=3) run; block_rows=64 -> 8192 points per block.
    n = 20000
    X = jax.random.uniform(key, (n, 2), dtype=jnp.float32)

    mn = jax.block_until_ready(
        multivariate_normal_pallas(X, mu, cov=cov,
                                   block_rows=64, min_pallas_points=0))
    ref = _reference(X, mu, cov=cov)
    np.testing.assert_allclose(np.asarray(mn), np.asarray(ref),
                               rtol=1e-5, atol=1e-6)

    # diag_cov path through the Pallas kernel.
    diag_cov = jnp.array([0.25, 0.15], dtype=jnp.float32)
    mn_d = jax.block_until_ready(
        multivariate_normal_pallas(X, mu, diag_cov=diag_cov,
                                   block_rows=64, min_pallas_points=0))
    ref_d = _reference(X, mu, diag_cov=diag_cov)
    np.testing.assert_allclose(np.asarray(mn_d), np.asarray(ref_d),
                               rtol=1e-5, atol=1e-6)

    # Tiny-n fast path (pure fused XLA, matches the module at n=8).
    Xs = jax.random.uniform(jax.random.PRNGKey(1), (8, 2), dtype=jnp.float32)
    mn_s = jax.block_until_ready(multivariate_normal_pallas(Xs, mu, cov=cov))
    ref_s = _reference(Xs, mu, cov=cov)
    np.testing.assert_allclose(np.asarray(mn_s), np.asarray(ref_s),
                               rtol=1e-5, atol=1e-6)

    print("KERNEL_OK")
</pallas_src>

<mosaic_0001>
module attributes {stable_mosaic.version = 11 : i64} {
  func.func @_mvn_kernel(%arg0: i32, %arg1: memref<8xf32, #tpu.memory_space<smem>>, %arg2: memref<64x128xf32, #tpu.memory_space<vmem>>, %arg3: memref<64x128xf32, #tpu.memory_space<vmem>>, %arg4: memref<64x128xf32, #tpu.memory_space<vmem>>) attributes {dimension_semantics = [#tpu.dimension_semantics<parallel>], iteration_bounds = array<i64: 3>, scalar_prefetch = 1 : i64, scratch_operands = 0 : i64, tpu.core_type = #tpu.core_type<tc>, window_params = [{transform_indices = @transform_0, window_bounds = array<i64: 64, 128>}, {transform_indices = @transform_1, window_bounds = array<i64: 64, 128>}, {transform_indices = @transform_2, window_bounds = array<i64: 64, 128>}]} {
    %c0 = arith.constant 0 : index
    %0 = memref.load %arg1[%c0] : memref<8xf32, #tpu.memory_space<smem>>
    %c1 = arith.constant 1 : index
    %1 = memref.load %arg1[%c1] : memref<8xf32, #tpu.memory_space<smem>>
    %c2 = arith.constant 2 : index
    %2 = memref.load %arg1[%c2] : memref<8xf32, #tpu.memory_space<smem>>
    %c3 = arith.constant 3 : index
    %3 = memref.load %arg1[%c3] : memref<8xf32, #tpu.memory_space<smem>>
    %c4 = arith.constant 4 : index
    %4 = memref.load %arg1[%c4] : memref<8xf32, #tpu.memory_space<smem>>
    %c5 = arith.constant 5 : index
    %5 = memref.load %arg1[%c5] : memref<8xf32, #tpu.memory_space<smem>>
    %c0_0 = arith.constant 0 : index
    %c0_1 = arith.constant 0 : index
    %6 = vector.load %arg2[%c0_0, %c0_1] : memref<64x128xf32, #tpu.memory_space<vmem>>, vector<64x128xf32>
    %7 = vector.broadcast %0 : f32 to vector<64x128xf32>
    %8 = arith.subf %6, %7 : vector<64x128xf32>
    %c0_2 = arith.constant 0 : index
    %c0_3 = arith.constant 0 : index
    %9 = vector.load %arg3[%c0_2, %c0_3] : memref<64x128xf32, #tpu.memory_space<vmem>>, vector<64x128xf32>
    %10 = vector.broadcast %1 : f32 to vector<64x128xf32>
    %11 = arith.subf %9, %10 : vector<64x128xf32>
    %12 = vector.broadcast %2 : f32 to vector<64x128xf32>
    %13 = arith.mulf %12, %8 : vector<64x128xf32>
    %14 = arith.mulf %13, %8 : vector<64x128xf32>
    %15 = vector.broadcast %3 : f32 to vector<64x128xf32>
    %16 = arith.mulf %15, %8 : vector<64x128xf32>
    %17 = arith.mulf %16, %11 : vector<64x128xf32>
    %18 = arith.addf %14, %17 : vector<64x128xf32>
    %19 = vector.broadcast %4 : f32 to vector<64x128xf32>
    %20 = arith.mulf %19, %11 : vector<64x128xf32>
    %21 = arith.mulf %20, %11 : vector<64x128xf32>
    %22 = arith.addf %18, %21 : vector<64x128xf32>
    %23 = math.exp %22 : vector<64x128xf32>
    %24 = vector.broadcast %5 : f32 to vector<64x128xf32>
    %25 = arith.mulf %23, %24 : vector<64x128xf32>
    %c0_4 = arith.constant 0 : index
    %c0_5 = arith.constant 0 : index
    %26 = vector.load %arg4[%c0_4, %c0_5] : memref<64x128xf32, #tpu.memory_space<vmem>>, vector<64x128xf32>
    tpu.vector_store %arg4[%c0_4, %c0_5], %25 {strides = array<i32>} : memref<64x128xf32, #tpu.memory_space<vmem>>, vector<64x128xf32>,
    return
  }
  func.func @transform_0(%arg0: i32, %arg1: memref<8xf32, #tpu.memory_space<smem>>) -> (i32, i32) {
    %c0_i32 = arith.constant 0 : i32
    %c0_i32_0 = arith.constant 0 : i32
    return %arg0, %c0_i32 : i32, i32
  }
  func.func @transform_1(%arg0: i32, %arg1: memref<8xf32, #tpu.memory_space<smem>>) -> (i32, i32) {
    %c0_i32 = arith.constant 0 : i32
    %c0_i32_0 = arith.constant 0 : i32
    return %arg0, %c0_i32 : i32, i32
  }
  func.func @transform_2(%arg0: i32, %arg1: memref<8xf32, #tpu.memory_space<smem>>) -> (i32, i32) {
    %c0_i32 = arith.constant 0 : i32
    %c0_i32_0 = arith.constant 0 : i32
    return %arg0, %c0_i32 : i32, i32
  }
}

</mosaic_0001>

<bundles_post_ra>
// kernel: tpu_custom_call.1
= control target key start
LH: loop header
LB: loop body
LE: loop exit
PB: predicated region body
PF: predicated region fallthrough
CT: control target
= control target key end

     0   :  { %s714_s15 = smov [#allocation3]   ;;  %s1004_s0 = inlined_call_operand.hbm [shape: f32[8], index: 0, kind: input, shape index: {}]   ;;  %s1005_s1 = inlined_call_operand.hbm [shape: f32[192,128], index: 1, kind: input, shape index: {}]   ;;  %s1006_s2 = inlined_call_operand.hbm [shape: f32[192,128], index: 2, kind: input, shape index: {}]   ;;  %s1007_s3 = inlined_call_operand.hbm [shape: f32[192,128], index: 3, kind: output, shape index: {}]  }
   0x1   :  { %s9_s14 = sshll.u32 %s1004_s0, 4  ;;  %s10_s14 = int_to_ptr.hbm [resolvable:$true] %s9_s14 }
   0x2   :  { %12 = dma.hbm_to_smem %s10_s14, 16, %s714_s15, [#allocation2] }
   0x3   :  { %684 = dma.done.wait [#allocation2], 16 }
   0x4   :  { %685 = vsyncadd [#allocation2], 4294967280 }
   0x5   :  { %15 = sfence }
   0x6   :  { %16 = vsyncpa [#allocation5], 0 }
   0x7   :  { %18 = vsyncpa [#allocation5 + $0x1], 0 }
   0x8   :  { %19 = vsyncpa [#allocation8], 0 }
   0x9   :  { %21 = vsyncpa [#allocation8 + $0x1], 0 }
   0xa   :  { %22 = vsyncpa [#allocation6], 0 }
   0xb   :  { %24 = vsyncpa [#allocation6 + $0x1], 0  ;;  %s742_s16 = smov 0   ;;  %s744_s17 = smov 0  }
   0xc   :  { %s746_s18 = smov 0   ;;  %s748_s19 = smov 0  }
   0xd LB: > { %s763_s0 = sadd.s32 4294967295, %s712_s19   ;;  %s470_s20 = sadd.s32 4294967294, %s712_s19   ;;  %s712_s19 = sphi %s748_s19, %s1017_s19   ;;  %s708_s18 = sphi %s746_s18, %s1016_s18   ;;  %s704_s17 = sphi %s744_s17, %s1015_s17   ;;  %s700_s16 = sphi %s742_s16, %s1014_s16  }
   0xe   : > { %s767_s21 = sadd.s32 1, %s712_s19   ;;  %s37_s22 = sadd.s32 1, %s708_s18 }
   0xf   : > { %s34_s23 = ssub.s32 %s712_s19, %s767_s21  ;;  %p44_p0 = scmp.ne.s32.totalorder %s708_s18, %s704_s17 }
  0x10   : > { %p35_p1 = scmp.eq.s32.totalorder %s34_s23, 0  ;;  %p45_p2 = scmp.eq.s32.totalorder %s712_s19, 0 }
  0x11   : > { %p50_p3 = scmp.ne.s32.totalorder %s704_s17, %s700_s16  ;;  %p51_p4 = scmp.eq.s32.totalorder %s763_s0, 0 }
  0x12   : > { %s779_s24 = scalar_select %p35_p1, %s708_s18, %s37_s22  }
  0x13   : > { %p781_p5 = por %p45_p2, %p44_p0  ;;  %p785_p6 = por %p51_p4, %p50_p3 }
  0x14   : > { %p100_p7 = scmp.eq.s32.totalorder %s763_s0, 2  ;;  %p106_p8 = scmp.eq.s32.totalorder %s470_s20, 2 }
  0x15   : > { %p513_p9 = scmp.lt.s32.totalorder %s712_s19, 3  ;;  %s800_s29 = sand.u32 1, %s708_s18  }
  0x16   : > { %p791_p10 = por %p100_p7, %p44_p0  ;;  %p795_p11 = por %p106_p8, %p50_p3 }
  0x17   : > { %s493_s30 = sshll.u32 %s712_s19, 6  ;;  %s473_s4 = sshll.u32 %s800_s29, 6 }
  0x18   : > { %s135_s7 = scalar_lea.hbm %s1005_s1, %s493_s30  ;;  %s130_s9 = scalar_lea.vmem [#allocation4], %s473_s4 }
  0x19   : > { %s136_s8 = sshll.u32 %s135_s7, 4  ;;  %s138_s10 = sshll.u32 %s130_s9, 4  ;;  %s137_s8 = int_to_ptr.hbm [resolvable:$true] %s136_s8  ;;  %s139_s10 = int_to_ptr.vmem [resolvable:$true] %s138_s10 }
  0x1a   : > { %p813_p12 = pnand %p513_p9, %p781_p5  ;;  %p479_p13 = scmp.ge.s32.totalorder %s712_s19, 1 }
  0x1b   : > { %p168_p0 = scmp.lt.s32.totalorder %s712_s19, 4  ;;  %s127_s12 = scalar_lea.sflag [#allocation5], %s800_s29 }
  0x1c   : > { %s580_s13 = sshra.s32 %s137_s8, 4  ;;  %p584_p2 = pneg %p813_p12  ;;  %s581_s13 = int_to_ptr.hbm [resolvable:$true] %s580_s13 }
  0x1d   : > { %s582_s14 = scalar_lea.hbm %s581_s13, 64  ;;  %s587_s22 = scalar_lea.hbm %s1005_s1, 192 }
  0x1e   : > { %p583_p1 = scmp.ne.s32.totalorder %s581_s13, %s582_s14  ;;  %p588_p5 = scmp.lt.s32.totalorder %s581_s13, %s1005_s1 }
  0x1f   : > { %p589_p7 = scmp.lt.s32.totalorder %s587_s22, %s582_s14 }
  0x20   : > { %p585_p3 = pnand %p584_p2, %p583_p1 }
  0x21   : > { %p590_p8 = por %p589_p7, %p588_p5 }
  0x22   : > { %p586_p4 = pneg %p585_p3 }
  0x24   : > { %p591_p9 = pnand %p590_p8, %p586_p4 }
  0x26   : > { %594 = shalt.err (!%p591_p9)
}
  0x27   : > { %s715_s5 = smov 128   ;;  %s716_s6 = smov 8  }
  0x28   : > { %505 = dma.hbm_to_vmem [thread:$0]  (!%p813_p12), %s137_s8, 1024, %s139_s10, %s127_s12, %s715_s5, %s715_s5, %s716_s6  }
  0x29   : > { %p837_p1 = pnand %p479_p13, %p168_p0  ;;  %s157_s14 = scalar_lea.hbm %s1006_s2, %s493_s30 }
  0x2a   : > { %s158_s15 = sshll.u32 %s157_s14, 4  ;;  %s152_s20 = scalar_lea.vmem [#allocation7], %s473_s4  ;;  %s159_s15 = int_to_ptr.hbm [resolvable:$true] %s158_s15 }
  0x2b   : > { %s160_s22 = sshll.u32 %s152_s20, 4  ;;  %s149_s23 = scalar_lea.sflag [#allocation8], %s800_s29  ;;  %s161_s22 = int_to_ptr.vmem [resolvable:$true] %s160_s22 }
  0x2c   : > { %s610_s25 = sshra.s32 %s159_s15, 4  ;;  %s617_s9 = scalar_lea.hbm %s1006_s2, 192  ;;  %s611_s25 = int_to_ptr.hbm [resolvable:$true] %s610_s25 }
  0x2d   : > { %s612_s8 = scalar_lea.hbm %s611_s25, 64  ;;  %p618_p4 = scmp.lt.s32.totalorder %s611_s25, %s1006_s2 }
  0x2e   : > { %p613_p3 = scmp.ne.s32.totalorder %s611_s25, %s612_s8  ;;  %p619_p5 = scmp.lt.s32.totalorder %s617_s9, %s612_s8 }
  0x30   : > { %p615_p13 = pnand %p613_p3, %p584_p2  ;;  %p620_p7 = por %p619_p5, %p618_p4 }
  0x32   : > { %p616_p0 = pneg %p615_p13 }
  0x34   : > { %p621_p8 = pnand %p620_p7, %p616_p0 }
  0x36   : > { %624 = shalt.err (!%p621_p8)
}
  0x37   : > { %508 = dma.hbm_to_vmem [thread:$0]  (!%p813_p12), %s159_s15, 1024, %s161_s22, %s149_s23, %s715_s5, %s715_s5, %s716_s6  }
  0x38   : > { %172 = sbr.rel (%p837_p1) target bundleno = 115 (0x73), region = 28  ;;  %s863_s29 = sand.u32 (!%p837_p1), 1, %s704_s17  }
  0x39   : > { %s866_s4 = sshll.u32 (!%p837_p1), %s863_s29, 6  ;;  %s175_s14 = scalar_lea.sflag (!%p837_p1), [#allocation5], %s863_s29 }
  0x3a   : > { %s870_s20 = scalar_lea.vmem (!%p837_p1), [#allocation4], %s866_s4 }
  0x3d   : > { %687 = dma.done.wait (%p785_p6), %s175_s14, 1024  }
  0x3e   : > { %689 = vsyncadd (%p785_p6), %s175_s14, 4294966272  ;;  %s185_s11 = scalar_lea.sflag [#allocation8], %s863_s29  ;;  %s878_s5 = scalar_lea.vmem [#allocation7], %s866_s4 }
  0x3f   : > { %691 = dma.done.wait (%p785_p6), %s185_s11, 1024  }
  0x40   : > { %693 = vsyncadd (%p785_p6), %s185_s11, 4294966272  ;;  %s218_s6 = sld [smem:[#allocation3]]  ;;  %v224_v0 = vld [vmem:[%s870_s20] sm:$0xff]  ;;  %v225_v3 = vld [vmem:[%s870_s20 + $0x8] sm:$0xff]  ;;  %s953_s26 = scalar_lea.vmem [#allocation9], %s866_s4 }
  0x41   : > { %s483_s7 = sld [smem:[#allocation3 + $0x1]]  ;;  %v241_v2 = vld [vmem:[%s878_s5] sm:$0xff]  ;;  %v242_v7 = vld [vmem:[%s878_s5 + $0x8] sm:$0xff]  ;;  %v226_v8 = vld [vmem:[%s870_s20 + $0x10] sm:$0xff]  ;;  %s495_s8 = sshll.u32 %s763_s0, 6 }
  0x42   : > { %s484_s15 = sld [smem:[#allocation3 + $0x2]]  ;;  %v243_v9 = vld [vmem:[%s878_s5 + $0x10] sm:$0xff]  ;;  %v227_v22 = vld [vmem:[%s870_s20 + $0x18] sm:$0xff]  ;;  %v228_v36 = vld [vmem:[%s870_s20 + $0x20] sm:$0xff]  ;;  %s370_s9 = scalar_lea.hbm %s1007_s3, %s495_s8 }
  0x43   : > { %s485_s22 = sld [smem:[#allocation3 + $0x3]]  ;;  %v244_v27 = vld [vmem:[%s878_s5 + $0x18] sm:$0xff]  ;;  %v245_v41 = vld [vmem:[%s878_s5 + $0x20] sm:$0xff]  ;;  %v229_v54 = vld [vmem:[%s870_s20 + $0x28] sm:$0xff]  ;;  %s371_s30 = sshll.u32 %s953_s26, 4  ;;  %s372_s30 = int_to_ptr.vmem [resolvable:$true] %s371_s30 }
  0x44   : > { %s486_s23 = sld [smem:[#allocation3 + $0x4]]  ;;  %v246_v55 = vld [vmem:[%s878_s5 + $0x28] sm:$0xff]  ;;  %s373_s13 = sshll.u32 %s370_s9, 4  ;;  %s374_s13 = int_to_ptr.hbm [resolvable:$true] %s373_s13 }
  0x45   : > { %s487_s25 = sld [smem:[#allocation3 + $0x5]]  ;;  %s359_s0 = scalar_lea.sflag [#allocation6], %s863_s29 }
  0x46   : > { %v885_v1 = vstv %s218_s6  ;;  %s654_s4 = sshra.s32 %s374_s13, 4  ;;  %s655_s4 = int_to_ptr.hbm [resolvable:$true] %s654_s4 }
  0x47   : > { %v233_v4 = vsub.f32 %v224_v0, %v885_v1  ;;  %v890_v5 = vstv %s483_s7  ;;  %v234_v6 = vsub.f32 %v225_v3, %v885_v1  ;;  %v235_v13 = vsub.f32 %v226_v8, %v885_v1  ;;  %s656_s14 = scalar_lea.hbm %s655_s4, 64  ;;  %p661_p9 = scmp.lt.s32.totalorder %s655_s4, %s1007_s3 }
  0x48   : > { %v250_v10 = vsub.f32 %v241_v2, %v890_v5  ;;  %v897_v11 = vstv %s484_s15  ;;  %v251_v12 = vsub.f32 %v242_v7, %v890_v5  ;;  %v252_v17 = vsub.f32 %v243_v9, %v890_v5  ;;  %v247_v9 = vld [vmem:[%s878_s5 + $0x30] sm:$0xff]  ;;  %p657_p6 = scmp.ne.s32.totalorder %s655_s4, %s656_s14 }
  0x49   : > { %v259_v14 = vmul.f32 %v897_v11, %v233_v4  ;;  %v902_v15 = vstv %s485_s22  ;;  %v260_v16 = vmul.f32 %v897_v11, %v234_v6  ;;  %v261_v21 = vmul.f32 %v897_v11, %v235_v13 }
  0x4a   : > { %v276_v18 = vmul.f32 %v902_v15, %v233_v4  ;;  %v907_v19 = vstv %s486_s23  ;;  %v277_v20 = vmul.f32 %v902_v15, %v234_v6  ;;  %v278_v33 = vmul.f32 %v902_v15, %v235_v13  ;;  %p658_p12 = pnand %p657_p6, %p791_p10 }
  0x4b   : > { %v267_v23 = vmul.f32 %v259_v14, %v233_v4  ;;  %v301_v24 = vmul.f32 %v907_v19, %v250_v10  ;;  %v913_v25 = vstv %s487_s25  ;;  %v268_v26 = vmul.f32 %v260_v16, %v234_v6  ;;  %v230_v4 = vld [vmem:[%s870_s20 + $0x30] sm:$0xff] }
  0x4c   : > { %v284_v28 = vmul.f32 %v276_v18, %v250_v10  ;;  %v285_v29 = vmul.f32 %v277_v20, %v251_v12  ;;  %v302_v30 = vmul.f32 %v907_v19, %v251_v12  ;;  %v269_v31 = vmul.f32 %v261_v21, %v235_v13  ;;  %v231_v20 = vld [vmem:[%s870_s20 + $0x38] sm:$0xff]  ;;  %p659_p2 = pneg %p658_p12 }
  0x4d   : > { %v309_v32 = vmul.f32 %v301_v24, %v250_v10  ;;  %v303_v34 = vmul.f32 %v907_v19, %v252_v17  ;;  %v236_v35 = vsub.f32 %v227_v22, %v885_v1  ;;  %v253_v40 = vsub.f32 %v244_v27, %v890_v5  ;;  %v248_v21 = vld [vmem:[%s878_s5 + $0x38] sm:$0xff]  ;;  %s660_s5 = scalar_lea.hbm %s1007_s3, 192 }
  0x4e   : > { %v292_v37 = vadd.f32 %v284_v28, %v267_v23  ;;  %v293_v38 = vadd.f32 %v285_v29, %v268_v26  ;;  %v310_v39 = vmul.f32 %v302_v30, %v251_v12  ;;  %v286_v42 = vmul.f32 %v278_v33, %v252_v17  ;;  %p662_p1 = scmp.lt.s32.totalorder %s660_s5, %s656_s14 }
  0x4f   : > { %v311_v43 = vmul.f32 %v303_v34, %v252_v17  ;;  %v262_v44 = vmul.f32 %v897_v11, %v236_v35  ;;  %v279_v45 = vmul.f32 %v902_v15, %v236_v35  ;;  %v304_v48 = vmul.f32 %v907_v19, %v253_v40 }
  0x50   : > { %v317_v46 = vadd.f32 %v309_v32, %v292_v37  ;;  %v318_v47 = vadd.f32 %v310_v39, %v293_v38  ;;  %v237_v49 = vsub.f32 %v228_v36, %v885_v1  ;;  %v294_v50 = vadd.f32 %v286_v42, %v269_v31  ;;  %p663_p3 = por %p662_p1, %p661_p9 }
  0x51   : > { %v270_v51 = vmul.f32 %v262_v44, %v236_v35  ;;  %v287_v52 = vmul.f32 %v279_v45, %v253_v40  ;;  %v254_v53 = vsub.f32 %v245_v41, %v890_v5  ;;  %v312_v58 = vmul.f32 %v304_v48, %v253_v40 }
  0x52   : > { %v325_v56 = vmul.f32 1.442695, %v317_v46  ;;  %v327_v57 = vmul.f32 1.442695, %v318_v47  ;;  %v263_v59 = vmul.f32 %v897_v11, %v237_v49  ;;  %v319_v60 = vadd.f32 %v311_v43, %v294_v50  ;;  %p664_p13 = pnand %p663_p3, %p659_p2 }
  0x53   : > { %v295_v61 = vadd.f32 %v287_v52, %v270_v51  ;;  %v280_v62 = vmul.f32 %v902_v15, %v237_v49  ;;  %v305_v63 = vmul.f32 %v907_v19, %v254_v53  ;;  %v238_v2 = vsub.f32 %v229_v54, %v885_v1 }
  0x54   : > { %552 = vpow2.f32 %v325_v56  ;;  %v271_v0 = vmul.f32 %v263_v59, %v237_v49  ;;  %v255_v3 = vsub.f32 %v246_v55, %v890_v5  ;;  %v329_v6 = vmul.f32 1.442695, %v319_v60 }
  0x55   : > { %554 = vpow2.f32 %v327_v57  ;;  %v320_v7 = vadd.f32 %v312_v58, %v295_v61  ;;  %v288_v8 = vmul.f32 %v280_v62, %v254_v53  ;;  %v313_v10 = vmul.f32 %v305_v63, %v254_v53 }
  0x56   : > { %v264_v12 = vmul.f32 %v897_v11, %v238_v2  ;;  %v281_v13 = vmul.f32 %v902_v15, %v238_v2  ;;  %v306_v14 = vmul.f32 %v907_v19, %v255_v3  ;;  %556 = vpow2.f32 %v329_v6 }
  0x57   : > { %v331_v16 = vmul.f32 1.442695, %v320_v7  ;;  %v296_v17 = vadd.f32 %v288_v8, %v271_v0  ;;  %v239_v18 = vsub.f32 %v230_v4, %v885_v1  ;;  %v256_v26 = vsub.f32 %v247_v9, %v890_v5 }
  0x58   : > { %v272_v22 = vmul.f32 %v264_v12, %v238_v2  ;;  %v289_v23 = vmul.f32 %v281_v13, %v255_v3  ;;  %v314_v24 = vmul.f32 %v306_v14, %v255_v3  ;;  %v240_v33 = vsub.f32 %v231_v20, %v885_v1 }
  0x59   : > { %558 = vpow2.f32 %v331_v16  ;;  %v321_v27 = vadd.f32 %v313_v10, %v296_v17  ;;  %v265_v28 = vmul.f32 %v897_v11, %v239_v18  ;;  %v282_v29 = vmul.f32 %v902_v15, %v239_v18 }
  0x5a   : > { %v553_v30 = vpop.eup %552  ;;  %v297_v31 = vadd.f32 %v289_v23, %v272_v22  ;;  %v307_v32 = vmul.f32 %v907_v19, %v256_v26  ;;  %v257_v34 = vsub.f32 %v248_v21, %v890_v5  ;;  %v266_v43 = vmul.f32 %v897_v11, %v240_v33 }
  0x5b   : > { %v555_v35 = vpop.eup %554  ;;  %v342_v36 = vmul.f32 %v553_v30, %v913_v25  ;;  %v333_v37 = vmul.f32 1.442695, %v321_v27  ;;  %v273_v38 = vmul.f32 %v265_v28, %v239_v18  ;;  %v290_v39 = vmul.f32 %v282_v29, %v256_v26 }
  0x5c   : > { %v343_v40 = vmul.f32 %v555_v35, %v913_v25  ;;  %v322_v41 = vadd.f32 %v314_v24, %v297_v31  ;;  %v315_v42 = vmul.f32 %v307_v32, %v256_v26  ;;  %v557_v44 = vpop.eup %556  ;;  %v283_v5 = vmul.f32 %v902_v15, %v240_v33 }
  0x5d   : > { %350 = vst [vmem:[%s953_s26] sm:$0xff] %v342_v36  ;;  %560 = vpow2.f32 %v333_v37  ;;  %v298_v1 = vadd.f32 %v290_v39, %v273_v38  ;;  %v308_v45 = vmul.f32 %v907_v19, %v257_v34  ;;  %v344_v46 = vmul.f32 %v557_v44, %v913_v25 }
  0x5e   : > { %351 = vst [vmem:[%s953_s26 + $0x8] sm:$0xff] %v343_v40  ;;  %v335_v47 = vmul.f32 1.442695, %v322_v41  ;;  %v274_v11 = vmul.f32 %v266_v43, %v240_v33  ;;  %v291_v50 = vmul.f32 %v283_v5, %v257_v34 }
  0x5f   : > { %v559_v48 = vpop.eup %558  ;;  %v323_v49 = vadd.f32 %v315_v42, %v298_v1  ;;  %v316_v51 = vmul.f32 %v308_v45, %v257_v34  ;;  %352 = vst [vmem:[%s953_s26 + $0x10] sm:$0xff] %v344_v46 }
  0x60   : > { %v345_v52 = vmul.f32 %v559_v48, %v913_v25  ;;  %562 = vpow2.f32 %v335_v47  ;;  %v299_v15 = vadd.f32 %v291_v50, %v274_v11 }
  0x61   : > { %v337_v53 = vmul.f32 1.442695, %v323_v49 }
  0x62   : > { %353 = vst [vmem:[%s953_s26 + $0x18] sm:$0xff] %v345_v52  ;;  %v324_v54 = vadd.f32 %v316_v51, %v299_v15 }
  0x63   : > { %v561_v19 = vpop.eup %560  ;;  %564 = vpow2.f32 %v337_v53 }
  0x64   : > { %v346_v55 = vmul.f32 %v561_v19, %v913_v25  ;;  %v339_v56 = vmul.f32 1.442695, %v324_v54 }
  0x66   : > { %v563_v57 = vpop.eup %562  ;;  %354 = vst [vmem:[%s953_s26 + $0x20] sm:$0xff] %v346_v55  ;;  %566 = vpow2.f32 %v339_v56 }
  0x67   : > { %v347_v58 = vmul.f32 %v563_v57, %v913_v25 }
  0x69   : > { %v565_v59 = vpop.eup %564  ;;  %355 = vst [vmem:[%s953_s26 + $0x28] sm:$0xff] %v347_v58 }
  0x6a   : > { %v348_v60 = vmul.f32 %v565_v59, %v913_v25 }
  0x6c   : > { %356 = vst [vmem:[%s953_s26 + $0x30] sm:$0xff] %v348_v60  ;;  %v567_v61 = vpop.eup %566 }
  0x6d   : > { %v349_v62 = vmul.f32 %v567_v61, %v913_v25 }
  0x6f   : > { %357 = vst [vmem:[%s953_s26 + $0x38] sm:$0xff] %v349_v62 }
  0x70   : > { %667 = shalt.err (!%p664_p13)
}
  0x71   : > { %s717_s29 = smov 128   ;;  %s718_s15 = smov 8  }
  0x72   : > { %500 = dma.vmem_to_hbm [thread:$0]  (%p791_p10), %s372_s30, 1024, %s374_s13, %s359_s0, %s717_s29, %s717_s29, %s718_s15  }
  0x73 PF: > { %p514_p0 = scmp.ge.s32.totalorder %s712_s19, 2  ;;  %s388_s22 = sand.u32 1, %s700_s16  }
  0x74   : > { %s389_s23 = scalar_lea.sflag [#allocation6], %s388_s22 }
  0x75   : > { %p510_p4 = pnand %p514_p0, %p795_p11 }
  0x77   : > { %p511_p5 = pneg %p510_p4 }
  0x79   : > { %695 = dma.done.wait (%p511_p5), %s389_s23, 1024  }
  0x7a   : > { %697 = vsyncadd (%p511_p5), %s389_s23, 4294966272  ;;  %p27_p7 = scmp.ge.s32.totalorder %s767_s21, 5   ;;  %s1014_s16 = smov %s704_s17 }
  0x7b   : > { %s1015_s17 = smov %s708_s18  ;;  %s1016_s18 = smov %s779_s24 }
  0x7c   : > { %s1017_s19 = smov %s767_s21  ;;  %29 = sbr.rel (!%p27_p7) target bundleno = 13 (0xd), region = 86 }
  0x81   :  { %395 = vsyncpa [#allocation5], 1 }
  0x82   :  { %397 = vsyncpa [#allocation5 + $0x1], 1 }
  0x83   :  { %398 = vsyncpa [#allocation8], 1 }
  0x84   :  { %400 = vsyncpa [#allocation8 + $0x1], 1 }
  0x85   :  { %401 = vsyncpa [#allocation6], 1 }
  0x86   :  { %403 = vsyncpa [#allocation6 + $0x1], 1 }

</bundles_post_ra>
